<compile_context>
chip_gen: v5e
topology: v5e:2x2
jax: 0.10.0
libtpu: 0.0.40
codegen_flags: <defaults>
</compile_context>

<pallas_src>
import jax
import jax.numpy as jnp
from jax.experimental import pallas as pl
from jax.experimental.pallas import tpu as pltpu

HIDDEN = 128
OUT = 4
OUT_PAD = 8              # padded logits width (block dim == full array dim)
NEG_SLOPE = 0.01
BN_EPS = 1e-5
DEFAULT_TILE_B = 2048    # bf16 x tile = 512 KiB; double-buffered IO + weights << scoped VMEM


def _round_up(n, m):
    return (n + m - 1) // m * m


def classifier_kernel(x_ref, w_ref, b_ref, w4_ref, b4_ref, o_ref):
    """One batch tile through the whole MLP head.

    x_ref : (tile_b, 128) bf16   batch tile
    w_ref : (3, 128, 128) bf16   hidden-layer weights with BN affine pre-folded
    b_ref : (3, 1, 128)   f32    folded biases
    w4_ref: (128, 8)      bf16   fc4 weight, output dim zero-padded 4 -> 8
    b4_ref: (1, 8)        f32    fc4 bias, zero-padded
    o_ref : (tile_b, 8)   f32    padded logits (first 4 lanes are real)
    """
    h = x_ref[...]                                   # bf16 activations
    for l in range(3):  # static unroll: fc -> (folded bn) -> leaky_relu
        a = jnp.dot(h, w_ref[l], preferred_element_type=jnp.float32) + b_ref[l]
        a = jnp.where(a > 0, a, NEG_SLOPE * a)       # f32 epilogue
        h = a.astype(jnp.bfloat16)
        # TODO(synk): training-mode dropout (p=0.5) not reproduced; eval
        # semantics (identity) are implemented instead.
    o_ref[...] = (
        jnp.dot(h, w4_ref[...], preferred_element_type=jnp.float32) + b4_ref[...]
    )


def init_params(key, input_size=HIDDEN, hidden_size=HIDDEN, output_size=OUT):
    """Deterministic PyTorch-style init (uniform(-1/sqrt(fan_in), 1/sqrt(fan_in)))."""
    params = {}
    dims = [
        ("fc1", input_size, hidden_size),
        ("fc2", hidden_size, hidden_size),
        ("fc3", hidden_size, hidden_size),
        ("fc4", hidden_size, output_size),
    ]
    for name, fan_in, fan_out in dims:
        key, kw, kb = jax.random.split(key, 3)
        bound = 1.0 / jnp.sqrt(float(fan_in))
        # stored as (in, out): transpose of PyTorch's (out, in)
        params[name + "_w"] = jax.random.uniform(
            kw, (fan_in, fan_out), jnp.float32, -bound, bound
        )
        params[name + "_b"] = jax.random.uniform(
            kb, (fan_out,), jnp.float32, -bound, bound
        )
    for name in ("bn1", "bn2", "bn3"):
        key, kg, kb, km, kv = jax.random.split(key, 5)
        params[name + "_gamma"] = 1.0 + 0.1 * jax.random.normal(kg, (hidden_size,), jnp.float32)
        params[name + "_beta"] = 0.1 * jax.random.normal(kb, (hidden_size,), jnp.float32)
        params[name + "_mean"] = 0.1 * jax.random.normal(km, (hidden_size,), jnp.float32)
        params[name + "_var"] = jnp.abs(
            1.0 + 0.1 * jax.random.normal(kv, (hidden_size,), jnp.float32)
        )
    return params


def prepare_params(params):
    """One-time prep: fold BN affine + bias into weights, pad fc4, cast to bf16.

    Hot-path (classifier_forward) consumes only the returned dict.
    """
    ws, bs = [], []
    for fc, bn in (("fc1", "bn1"), ("fc2", "bn2"), ("fc3", "bn3")):
        inv = 1.0 / jnp.sqrt(params[bn + "_var"] + BN_EPS)
        s = params[bn + "_gamma"] * inv
        t = params[bn + "_beta"] - params[bn + "_mean"] * s
        ws.append((params[fc + "_w"] * s[None, :]).astype(jnp.bfloat16))  # column-scaled W
        bs.append((params[fc + "_b"] * s + t)[None, :])                   # folded bias (f32)
    w123 = jnp.stack(ws)                                   # (3, 128, 128) bf16
    b123 = jnp.stack(bs).astype(jnp.float32)               # (3, 1, 128)   f32

    # fc4: zero-pad output dim 4 -> 8 (cheap lane pad; block dim == array dim).
    w4 = (
        jnp.zeros((HIDDEN, OUT_PAD), jnp.float32)
        .at[:, :OUT].set(params["fc4_w"])
        .astype(jnp.bfloat16)
    )
    b4 = jnp.zeros((1, OUT_PAD), jnp.float32).at[0, :OUT].set(params["fc4_b"])
    return {"w123": w123, "b123": b123, "w4": w4, "b4": b4}


def classifier_forward(x, prepped, *, tile_b=DEFAULT_TILE_B):
    """Batch-tiled Pallas forward pass. Returns (B, 4) f32 logits."""
    B, D = x.shape
    assert D == HIDDEN, D
    x = x.astype(jnp.bfloat16)

    w123, b123 = prepped["w123"], prepped["b123"]
    w4, b4 = prepped["w4"], prepped["b4"]

    # batch tile: multiple of 8 sublanes, no larger than the (rounded) batch.
    tile_b = max(8, min(_round_up(tile_b, 8), _round_up(B, 8)))
    # v7x: ensure >= 2 grid steps so dimension_semantics=("parallel",) can
    # shard the batch across both TensorCores (no-op on v5e/v6e).
    if B > 8:
        tile_b = min(tile_b, _round_up(pl.cdiv(B, 2), 8))
    grid = (pl.cdiv(B, tile_b),)

    flops = 2 * B * HIDDEN * (3 * HIDDEN + OUT_PAD)
    bytes_accessed = (
        B * HIDDEN * 2                    # bf16 input read
        + B * OUT_PAD * 4                 # f32 padded-logit write
        + w123.size * 2 + b123.size * 4
        + w4.size * 2 + b4.size * 4
    )

    out_padded = pl.pallas_call(
        classifier_kernel,
        out_shape=jax.ShapeDtypeStruct((B, OUT_PAD), jnp.float32),
        grid=grid,
        in_specs=[
            pl.BlockSpec((tile_b, HIDDEN), lambda i: (i, 0)),         # x: batch-tiled
            pl.BlockSpec((3, HIDDEN, HIDDEN), lambda i: (0, 0, 0)),   # weights: constant index_map
            pl.BlockSpec((3, 1, HIDDEN), lambda i: (0, 0, 0)),        #   -> no re-DMA across steps
            pl.BlockSpec((HIDDEN, OUT_PAD), lambda i: (0, 0)),
            pl.BlockSpec((1, OUT_PAD), lambda i: (0, 0)),
        ],
        out_specs=pl.BlockSpec((tile_b, OUT_PAD), lambda i: (i, 0)),
        compiler_params=pltpu.CompilerParams(
            dimension_semantics=("parallel",),
        ),
        cost_estimate=pl.CostEstimate(
            flops=flops, transcendentals=0, bytes_accessed=bytes_accessed
        ),
    )(x, w123, b123, w4, b4)

    return out_padded[:, :OUT]


def reference_forward(x, params):
    """Pure-JAX f32 reference, PyTorch op order (fc -> bn -> leaky_relu) x3 -> fc4."""
    h = x
    for fc, bn in (("fc1", "bn1"), ("fc2", "bn2"), ("fc3", "bn3")):
        h = h @ params[fc + "_w"] + params[fc + "_b"]
        inv = 1.0 / jnp.sqrt(params[bn + "_var"] + BN_EPS)
        h = (h - params[bn + "_mean"]) * inv * params[bn + "_gamma"] + params[bn + "_beta"]
        h = jnp.where(h > 0, h, NEG_SLOPE * h)
    return h @ params["fc4_w"] + params["fc4_b"]


def reference_forward_prepped(x, prepped):
    """Pure-JAX reference with the exact same bf16/f32 arithmetic as the kernel."""
    h = x.astype(jnp.bfloat16)
    for l in range(3):
        a = jnp.dot(h, prepped["w123"][l], preferred_element_type=jnp.float32) + prepped["b123"][l]
        a = jnp.where(a > 0, a, NEG_SLOPE * a)
        h = a.astype(jnp.bfloat16)
    out = jnp.dot(h, prepped["w4"], preferred_element_type=jnp.float32) + prepped["b4"]
    return out[:, :OUT]


if __name__ == "__main__":
    key = jax.random.PRNGKey(0)
    key, kx, kp = jax.random.split(key, 3)

    B = 64  # small batch; tile_b=16 exercises 4 grid steps
    x = jax.random.normal(kx, (B, HIDDEN), jnp.float32)
    params = init_params(kp)

    prepped = prepare_params(params)          # one-time parameter prep
    out = classifier_forward(x, prepped, tile_b=16)
    out = jax.block_until_ready(out)
    assert out.shape == (B, OUT), out.shape

    # (a) exact-arithmetic check vs a bf16-matched pure-JAX reference.
    ref_bf16 = reference_forward_prepped(x, prepped)
    assert jnp.allclose(out, ref_bf16, atol=5e-3, rtol=5e-3), float(
        jnp.max(jnp.abs(out - ref_bf16))
    )

    # (b) semantic check vs the original f32 PyTorch-ordered math
    #     (tolerance relaxed for bf16 matmul inputs, f32 accumulation).
    ref_f32 = reference_forward(x, params)
    assert jnp.allclose(out, ref_f32, atol=5e-2, rtol=5e-2), float(
        jnp.max(jnp.abs(out - ref_f32))
    )

    print("KERNEL_OK")
</pallas_src>

<mosaic_0001>
module attributes {stable_mosaic.version = 11 : i64} {
  func.func @classifier_kernel(%arg0: i32, %arg1: memref<16x128xbf16, #tpu.memory_space<vmem>>, %arg2: memref<3x128x128xbf16, #tpu.memory_space<vmem>>, %arg3: memref<3x1x128xf32, #tpu.memory_space<vmem>>, %arg4: memref<128x8xbf16, #tpu.memory_space<vmem>>, %arg5: memref<1x8xf32, #tpu.memory_space<vmem>>, %arg6: memref<16x8xf32, #tpu.memory_space<vmem>>) attributes {dimension_semantics = [#tpu.dimension_semantics<parallel>], iteration_bounds = array<i64: 4>, scalar_prefetch = 0 : i64, scratch_operands = 0 : i64, tpu.core_type = #tpu.core_type<tc>, window_params = [{transform_indices = @transform_0, window_bounds = array<i64: 16, 128>}, {pipeline_mode = #tpu.pipeline_mode<synchronous>, transform_indices = @transform_1, window_bounds = array<i64: 3, 128, 128>}, {pipeline_mode = #tpu.pipeline_mode<synchronous>, transform_indices = @transform_2, window_bounds = array<i64: 3, 1, 128>}, {pipeline_mode = #tpu.pipeline_mode<synchronous>, transform_indices = @transform_3, window_bounds = array<i64: 128, 8>}, {pipeline_mode = #tpu.pipeline_mode<synchronous>, transform_indices = @transform_4, window_bounds = array<i64: 1, 8>}, {transform_indices = @transform_5, window_bounds = array<i64: 16, 8>}]} {
    %c0 = arith.constant 0 : index
    %c0_0 = arith.constant 0 : index
    %0 = vector.load %arg1[%c0, %c0_0] : memref<16x128xbf16, #tpu.memory_space<vmem>>, vector<16x128xbf16>
    %c0_1 = arith.constant 0 : index
    %c0_2 = arith.constant 0 : index
    %c0_3 = arith.constant 0 : index
    %1 = vector.load %arg2[%c0_1, %c0_2, %c0_3] : memref<3x128x128xbf16, #tpu.memory_space<vmem>>, vector<1x128x128xbf16>
    %2 = vector.shape_cast %1 : vector<1x128x128xbf16> to vector<128x128xbf16>
    %cst = arith.constant dense<0.000000e+00> : vector<16x128xf32>
    %3 = tpu.matmul %0, %2, %cst {dimension_numbers = #tpu.dot_dimension_numbers<[1], [0], [0], [1], [0, 0, 1, 1], [], []>} : vector<16x128xbf16>, vector<128x128xbf16>, vector<16x128xf32> -> vector<16x128xf32>
    %c0_4 = arith.constant 0 : index
    %c0_5 = arith.constant 0 : index
    %c0_6 = arith.constant 0 : index
    %4 = vector.load %arg3[%c0_4, %c0_5, %c0_6] : memref<3x1x128xf32, #tpu.memory_space<vmem>>, vector<1x1x128xf32>
    %5 = vector.shape_cast %4 : vector<1x1x128xf32> to vector<1x128xf32>
    %6 = vector.broadcast %5 : vector<1x128xf32> to vector<16x128xf32>
    %7 = arith.addf %3, %6 : vector<16x128xf32>
    %cst_7 = arith.constant 0.000000e+00 : f32
    %8 = vector.broadcast %cst_7 : f32 to vector<16x128xf32>
    %9 = arith.cmpf ogt, %7, %8 : vector<16x128xf32>
    %cst_8 = arith.constant 0.00999999977 : f32
    %10 = vector.broadcast %cst_8 : f32 to vector<16x128xf32>
    %11 = arith.mulf %10, %7 : vector<16x128xf32>
    %12 = arith.select %9, %7, %11 : vector<16x128xi1>, vector<16x128xf32>
    %13 = arith.truncf %12 : vector<16x128xf32> to vector<16x128xbf16>
    %c1 = arith.constant 1 : index
    %c0_9 = arith.constant 0 : index
    %c0_10 = arith.constant 0 : index
    %14 = vector.load %arg2[%c1, %c0_9, %c0_10] : memref<3x128x128xbf16, #tpu.memory_space<vmem>>, vector<1x128x128xbf16>
    %15 = vector.shape_cast %14 : vector<1x128x128xbf16> to vector<128x128xbf16>
    %cst_11 = arith.constant dense<0.000000e+00> : vector<16x128xf32>
    %16 = tpu.matmul %13, %15, %cst_11 {dimension_numbers = #tpu.dot_dimension_numbers<[1], [0], [0], [1], [0, 0, 1, 1], [], []>} : vector<16x128xbf16>, vector<128x128xbf16>, vector<16x128xf32> -> vector<16x128xf32>
    %c1_12 = arith.constant 1 : index
    %c0_13 = arith.constant 0 : index
    %c0_14 = arith.constant 0 : index
    %17 = vector.load %arg3[%c1_12, %c0_13, %c0_14] : memref<3x1x128xf32, #tpu.memory_space<vmem>>, vector<1x1x128xf32>
    %18 = vector.shape_cast %17 : vector<1x1x128xf32> to vector<1x128xf32>
    %19 = vector.broadcast %18 : vector<1x128xf32> to vector<16x128xf32>
    %20 = arith.addf %16, %19 : vector<16x128xf32>
    %cst_15 = arith.constant 0.000000e+00 : f32
    %21 = vector.broadcast %cst_15 : f32 to vector<16x128xf32>
    %22 = arith.cmpf ogt, %20, %21 : vector<16x128xf32>
    %cst_16 = arith.constant 0.00999999977 : f32
    %23 = vector.broadcast %cst_16 : f32 to vector<16x128xf32>
    %24 = arith.mulf %23, %20 : vector<16x128xf32>
    %25 = arith.select %22, %20, %24 : vector<16x128xi1>, vector<16x128xf32>
    %26 = arith.truncf %25 : vector<16x128xf32> to vector<16x128xbf16>
    %c2 = arith.constant 2 : index
    %c0_17 = arith.constant 0 : index
    %c0_18 = arith.constant 0 : index
    %27 = vector.load %arg2[%c2, %c0_17, %c0_18] : memref<3x128x128xbf16, #tpu.memory_space<vmem>>, vector<1x128x128xbf16>
    %28 = vector.shape_cast %27 : vector<1x128x128xbf16> to vector<128x128xbf16>
    %cst_19 = arith.constant dense<0.000000e+00> : vector<16x128xf32>
    %29 = tpu.matmul %26, %28, %cst_19 {dimension_numbers = #tpu.dot_dimension_numbers<[1], [0], [0], [1], [0, 0, 1, 1], [], []>} : vector<16x128xbf16>, vector<128x128xbf16>, vector<16x128xf32> -> vector<16x128xf32>
    %c2_20 = arith.constant 2 : index
    %c0_21 = arith.constant 0 : index
    %c0_22 = arith.constant 0 : index
    %30 = vector.load %arg3[%c2_20, %c0_21, %c0_22] : memref<3x1x128xf32, #tpu.memory_space<vmem>>, vector<1x1x128xf32>
    %31 = vector.shape_cast %30 : vector<1x1x128xf32> to vector<1x128xf32>
    %32 = vector.broadcast %31 : vector<1x128xf32> to vector<16x128xf32>
    %33 = arith.addf %29, %32 : vector<16x128xf32>
    %cst_23 = arith.constant 0.000000e+00 : f32
    %34 = vector.broadcast %cst_23 : f32 to vector<16x128xf32>
    %35 = arith.cmpf ogt, %33, %34 : vector<16x128xf32>
    %cst_24 = arith.constant 0.00999999977 : f32
    %36 = vector.broadcast %cst_24 : f32 to vector<16x128xf32>
    %37 = arith.mulf %36, %33 : vector<16x128xf32>
    %38 = arith.select %35, %33, %37 : vector<16x128xi1>, vector<16x128xf32>
    %39 = arith.truncf %38 : vector<16x128xf32> to vector<16x128xbf16>
    %c0_25 = arith.constant 0 : index
    %c0_26 = arith.constant 0 : index
    %40 = vector.load %arg4[%c0_25, %c0_26] : memref<128x8xbf16, #tpu.memory_space<vmem>>, vector<128x8xbf16>
    %cst_27 = arith.constant dense<0.000000e+00> : vector<16x8xf32>
    %41 = tpu.matmul %39, %40, %cst_27 {dimension_numbers = #tpu.dot_dimension_numbers<[1], [0], [0], [1], [0, 0, 1, 1], [], []>} : vector<16x128xbf16>, vector<128x8xbf16>, vector<16x8xf32> -> vector<16x8xf32>
    %c0_28 = arith.constant 0 : index
    %c0_29 = arith.constant 0 : index
    %42 = vector.load %arg5[%c0_28, %c0_29] : memref<1x8xf32, #tpu.memory_space<vmem>>, vector<1x8xf32>
    %43 = vector.broadcast %42 : vector<1x8xf32> to vector<16x8xf32>
    %44 = arith.addf %41, %43 : vector<16x8xf32>
    %c0_30 = arith.constant 0 : index
    %c0_31 = arith.constant 0 : index
    %45 = vector.load %arg6[%c0_30, %c0_31] : memref<16x8xf32, #tpu.memory_space<vmem>>, vector<16x8xf32>
    tpu.vector_store %arg6[%c0_30, %c0_31], %44 {strides = array<i32>} : memref<16x8xf32, #tpu.memory_space<vmem>>, vector<16x8xf32>,
    return
  }
  func.func @transform_0(%arg0: i32) -> (i32, i32) {
    %c0_i32 = arith.constant 0 : i32
    %c0_i32_0 = arith.constant 0 : i32
    return %arg0, %c0_i32 : i32, i32
  }
  func.func @transform_1(%arg0: i32) -> (i32, i32, i32) {
    %c0_i32 = arith.constant 0 : i32
    %c0_i32_0 = arith.constant 0 : i32
    %c0_i32_1 = arith.constant 0 : i32
    %c0_i32_2 = arith.constant 0 : i32
    return %c0_i32, %c0_i32_0, %c0_i32_1 : i32, i32, i32
  }
  func.func @transform_2(%arg0: i32) -> (i32, i32, i32) {
    %c0_i32 = arith.constant 0 : i32
    %c0_i32_0 = arith.constant 0 : i32
    %c0_i32_1 = arith.constant 0 : i32
    %c0_i32_2 = arith.constant 0 : i32
    return %c0_i32, %c0_i32_0, %c0_i32_1 : i32, i32, i32
  }
  func.func @transform_3(%arg0: i32) -> (i32, i32) {
    %c0_i32 = arith.constant 0 : i32
    %c0_i32_0 = arith.constant 0 : i32
    %c0_i32_1 = arith.constant 0 : i32
    return %c0_i32, %c0_i32_0 : i32, i32
  }
  func.func @transform_4(%arg0: i32) -> (i32, i32) {
    %c0_i32 = arith.constant 0 : i32
    %c0_i32_0 = arith.constant 0 : i32
    %c0_i32_1 = arith.constant 0 : i32
    return %c0_i32, %c0_i32_0 : i32, i32
  }
  func.func @transform_5(%arg0: i32) -> (i32, i32) {
    %c0_i32 = arith.constant 0 : i32
    %c0_i32_0 = arith.constant 0 : i32
    return %arg0, %c0_i32 : i32, i32
  }
}

</mosaic_0001>

<bundles_post_ra>
// kernel: tpu_custom_call.1
= control target key start
LH: loop header
LB: loop body
LE: loop exit
PB: predicated region body
PF: predicated region fallthrough
CT: control target
= control target key end

     0   :  { %10 = vsyncpa [#allocation3], 0  ;;  %s957_s18 = smov 0   ;;  %s1017_s0 = inlined_call_operand.vmem [shape: bf16[64,128], index: 0, kind: input, shape index: {}]   ;;  %s1018_s1 = inlined_call_operand.hbm [shape: bf16[3,128,128], index: 1, kind: input, shape index: {}]   ;;  %s1019_s2 = inlined_call_operand.vmem [shape: f32[3,1,128], index: 2, kind: input, shape index: {}]   ;;  %s1020_s3 = inlined_call_operand.vmem [shape: bf16[128,8], index: 3, kind: input, shape index: {}]   ;;  %s1021_s4 = inlined_call_operand.vmem [shape: f32[1,8], index: 4, kind: input, shape index: {}]   ;;  %s1022_s5 = inlined_call_operand.vmem [shape: f32[64,8], index: 5, kind: output, shape index: {}]  }
   0x1 LB: > { %s168_s21 = sshll.u32 %s1018_s1, 4  ;;  %s677_s22 = sadd.s32 4294967295, %s922_s18   ;;  %s922_s18 = sphi %s957_s18, %s16_s18   ;;  %s169_s21 = int_to_ptr.hbm [resolvable:$true] %s168_s21 }
   0x2   : > { %p679_p0 = scmp.ge.s32.totalorder %s922_s18, 1  ;;  %p157_p1 = scmp.lt.s32.totalorder %s922_s18, 5 }
   0x3   : > { %p865_p2 = scmp.eq.s32.totalorder %s677_s22, 0  ;;  %s924_s23 = smov [#allocation2]  }
   0x4   : > { %p158_p3 = pnand %p679_p0, %p157_p1  ;;  %s170_s24 = sshll.u32 %s924_s23, 4  ;;  %s171_s24 = int_to_ptr.vmem [resolvable:$true] %s170_s24 }
   0x5   : > { %s925_s25 = smov 64   ;;  %s926_s26 = smov 4  }
   0x6   : > { %p861_p4 = pneg %p158_p3  ;;  %204 = sbr.rel (%p158_p3) target bundleno = 616 (0x268), region = 40 }
   0x8   : > { %p862_p5 = pnand %p865_p2, %p861_p4 }
   0xa   : > { %864 = dma.hbm_to_vmem [thread:$0]  (!%p862_p5), %s169_s21, 3072, %s171_s24, [#allocation3], %s925_s25, %s925_s25, %s926_s26  }
   0xb   : > { %917 = dma.done.wait (%p865_p2), [#allocation3], 3072  }
   0xc   : > { %919 = vsyncadd (%p865_p2), [#allocation3], 4294964224  ;;  %v832_v0 = vld [vmem:[#allocation2 + $0x38] sm:$0xff]  ;;  %v831_v1 = vld [vmem:[#allocation2 + $0x30] sm:$0xff]  ;;  %s684_s27 = sshll.u32 %s677_s22, 1  ;;  %vm606_vm6 = vcmask 64512  }
   0xd   : > { %321 = vmatpush.bf16.msra.mxu0 %v832_v0  ;;  %v840_v2 = vld [vmem:[#allocation2 + $0x78] sm:$0xff]  ;;  %v839_v3 = vld [vmem:[#allocation2 + $0x70] sm:$0xff]  ;;  %v830_v4 = vld [vmem:[#allocation2 + $0x28] sm:$0xff]  ;;  %p234_p6 = scmp.lt.s32.totalorder %s684_s27, 7 }
   0xe   : > { %412 = vmatpush.bf16.msra.mxu1 %v840_v2  ;;  %v838_v5 = vld [vmem:[#allocation2 + $0x68] sm:$0xff]  ;;  %v829_v6 = vld [vmem:[#allocation2 + $0x20] sm:$0xff]  ;;  %v828_v8 = vld [vmem:[#allocation2 + $0x18] sm:$0xff] }
   0xf   : > { %v837_v7 = vld [vmem:[#allocation2 + $0x60] sm:$0xff]  ;;  %v827_v9 = vld [vmem:[#allocation2 + $0x10] sm:$0xff]  ;;  %s1024_s27 = smov (!%p234_p6, %s684_s27), 7  ;;  %v826_v10 = vld [vmem:[#allocation2 + $0x8] sm:$0xff] }
  0x10   : > { %s685_s28 = sshll.u32 %s1024_s27, 2  ;;  %v825_v11 = vld [vmem:[#allocation2] sm:$0xff]  ;;  %v836_v13 = vld [vmem:[#allocation2 + $0x58] sm:$0xff]  ;;  %v835_v14 = vld [vmem:[#allocation2 + $0x50] sm:$0xff] }
  0x11   : > { %322 = vmatpush.bf16.msra.mxu0 %v831_v1  ;;  %s237_s6 = scalar_lea.vmem %s1017_s0, %s685_s28  ;;  %v834_v15 = vld [vmem:[#allocation2 + $0x48] sm:$0xff]  ;;  %v833_v16 = vld [vmem:[#allocation2 + $0x40] sm:$0xff]  ;;  %v848_v17 = vld [vmem:[#allocation2 + $0xb8] sm:$0xff] }
  0x12   : > { %413 = vmatpush.bf16.msra.mxu1 %v839_v3  ;;  %v824_v12 = vld [vmem:[%s237_s6] sm:$0xff]  ;;  %503 = vmatpush.bf16.msra.mxu2 %v848_v17  ;;  %v847_v18 = vld [vmem:[#allocation2 + $0xb0] sm:$0xff]  ;;  %v846_v19 = vld [vmem:[#allocation2 + $0xa8] sm:$0xff]  ;;  %s687_s6 = sshll.u32 %s1024_s27, 3 }
  0x13   : > { %v845_v20 = vld [vmem:[#allocation2 + $0xa0] sm:$0xff]  ;;  %v844_v31 = vld [vmem:[#allocation2 + $0x98] sm:$0xff]  ;;  %v843_v32 = vld [vmem:[#allocation2 + $0x90] sm:$0xff]  ;;  %s243_s11 = scalar_lea.vmem %s1022_s5, %s687_s6 }
  0x14   : > { %v878_v22 = vld [vmem:[%s1019_s2] ss:$0 sm:$0xff]  ;;  %v842_v33 = vld [vmem:[#allocation2 + $0x88] sm:$0xff]  ;;  %v856_v35 = vld [vmem:[%s1020_s3 + $0x38] sm:$0xff] }
  0x15   : > { %323 = vmatpush.bf16.msra.mxu0 %v830_v4  ;;  %v841_v34 = vld [vmem:[#allocation2 + $0x80] sm:$0xff]  ;;  %592 = vmatpush.bf16.msra.mxu3 %v856_v35  ;;  %v855_v36 = vld [vmem:[%s1020_s3 + $0x30] sm:$0xff]  ;;  %v854_v37 = vld [vmem:[%s1020_s3 + $0x28] sm:$0xff] }
  0x16   : > { %414 = vmatpush.bf16.msra.mxu1 %v838_v5  ;;  %504 = vmatpush.bf16.msra.mxu2 %v847_v18  ;;  %v853_v38 = vld [vmem:[%s1020_s3 + $0x20] sm:$0xff]  ;;  %v852_v49 = vld [vmem:[%s1020_s3 + $0x18] sm:$0xff]  ;;  %v851_v50 = vld [vmem:[%s1020_s3 + $0x10] sm:$0xff] }
  0x17   : > { %v879_v40 = vld [vmem:[%s1019_s2 + $0x1] ss:$0 sm:$0xff]  ;;  %v850_v51 = vld [vmem:[%s1020_s3 + $0x8] sm:$0xff]  ;;  %v880_v54 = vld [vmem:[%s1019_s2 + $0x2] ss:$0 sm:$0xff] }
  0x18   : > { %v849_v52 = vld [vmem:[%s1020_s3] sm:$0xff] }
  0x19   : > { %324 = vmatpush.bf16.msra.mxu0 %v829_v6  ;;  %593 = vmatpush.bf16.msra.mxu3 %v855_v36  ;;  %v881_v63 = vld [vmem:[%s1021_s4] ss:$0 sm:$0xff] }
  0x1a   : > { %415 = vmatpush.bf16.msra.mxu1 %v837_v7  ;;  %505 = vmatpush.bf16.msra.mxu2 %v846_v19 }
  0x1d   : > { %325 = vmatpush.bf16.msra.mxu0 %v828_v8  ;;  %594 = vmatpush.bf16.msra.mxu3 %v854_v37 }
  0x1e   : > { %416 = vmatpush.bf16.msra.mxu1 %v836_v13  ;;  %506 = vmatpush.bf16.msra.mxu2 %v845_v20 }
  0x21   : > { %326 = vmatpush.bf16.msra.mxu0 %v827_v9  ;;  %595 = vmatpush.bf16.msra.mxu3 %v853_v38 }
  0x22   : > { %417 = vmatpush.bf16.msra.mxu1 %v835_v14  ;;  %507 = vmatpush.bf16.msra.mxu2 %v844_v31 }
  0x25   : > { %327 = vmatpush.bf16.msra.mxu0 %v826_v10  ;;  %596 = vmatpush.bf16.msra.mxu3 %v852_v49 }
  0x26   : > { %418 = vmatpush.bf16.msra.mxu1 %v834_v15  ;;  %508 = vmatpush.bf16.msra.mxu2 %v843_v32 }
  0x29   : > { %328 = vmatpush.bf16.msra.mxu0 %v825_v11  ;;  %597 = vmatpush.bf16.msra.mxu3 %v851_v50 }
  0x2a   : > { %419 = vmatpush.bf16.msra.mxu1 %v833_v16  ;;  %509 = vmatpush.bf16.msra.mxu2 %v842_v33 }
  0x2c   : > { %329 = vmatmul.bf16.vlgmr.msra.gmra.mxu0 %v824_v12 }
  0x2d   : > { %598 = vmatpush.bf16.msra.mxu3 %v850_v51 }
  0x2e   : > { %510 = vmatpush.bf16.msra.mxu2 %v841_v34 }
  0x31   : > { %599 = vmatpush.bf16.msra.mxu3 %v849_v52 }
  0xa9   : > { %v330_v21 = vpop.f32.mrf.mxu0 }
  0xaa   : > { %v331_v23 = vadd.f32 %v878_v22, %v330_v21 }
  0xac   : > { %v337_v25 = vmul.f32 0.01, %v331_v23  ;;  %vm335_vm0 = vcmp.gt.f32.partialorder %v331_v23, 0.0 }
  0xae   : > { %v339_v28 = vsel %vm335_vm0, %v331_v23, %v337_v25 }
  0xb1   : > { %v332_v24 = vpop.f32.mrf.mxu0 }
  0xb2   : > { %v333_v26 = vadd.f32 %v878_v22, %v332_v24 }
  0xb4   : > { %v338_v27 = vmul.f32 0.01, %v333_v26  ;;  %vm336_vm1 = vcmp.gt.f32.partialorder %v333_v26, 0.0 }
  0xb6   : > { %v340_v29 = vsel %vm336_vm1, %v333_v26, %v338_v27 }
  0xb7   : > { %v341_v30 = vpack.c.bf16 %v340_v29, %v339_v28 }
  0xb9   : > { %420 = vmatmul.bf16.vlgmr.msra.gmra.mxu1 %v341_v30 }
 0x136   : > { %v421_v39 = vpop.f32.mrf.mxu1 }
 0x137   : > { %v422_v41 = vadd.f32 %v879_v40, %v421_v39 }
 0x139   : > { %v428_v43 = vmul.f32 0.01, %v422_v41  ;;  %vm426_vm2 = vcmp.gt.f32.partialorder %v422_v41, 0.0 }
 0x13b   : > { %v430_v46 = vsel %vm426_vm2, %v422_v41, %v428_v43 }
 0x13e   : > { %v423_v42 = vpop.f32.mrf.mxu1 }
 0x13f   : > { %v424_v44 = vadd.f32 %v879_v40, %v423_v42 }
 0x141   : > { %v429_v45 = vmul.f32 0.01, %v424_v44  ;;  %vm427_vm3 = vcmp.gt.f32.partialorder %v424_v44, 0.0 }
 0x143   : > { %v431_v47 = vsel %vm427_vm3, %v424_v44, %v429_v45 }
 0x144   : > { %v432_v48 = vpack.c.bf16 %v431_v47, %v430_v46 }
 0x146   : > { %511 = vmatmul.bf16.vlgmr.msra.gmra.mxu2 %v432_v48 }
 0x1c9   : > { %v512_v53 = vpop.f32.mrf.mxu2 }
 0x1ca   : > { %v513_v55 = vadd.f32 %v880_v54, %v512_v53 }
 0x1cc   : > { %v519_v57 = vmul.f32 0.01, %v513_v55  ;;  %vm517_vm4 = vcmp.gt.f32.partialorder %v513_v55, 0.0 }
 0x1ce   : > { %v521_v60 = vsel %vm517_vm4, %v513_v55, %v519_v57 }
 0x1d1   : > { %v514_v56 = vpop.f32.mrf.mxu2 }
 0x1d2   : > { %v515_v58 = vadd.f32 %v880_v54, %v514_v56 }
 0x1d4   : > { %v520_v59 = vmul.f32 0.01, %v515_v58  ;;  %vm518_vm5 = vcmp.gt.f32.partialorder %v515_v58, 0.0 }
 0x1d6   : > { %v522_v61 = vsel %vm518_vm5, %v515_v58, %v520_v59 }
 0x1d7   : > { %v523_v62 = vpack.c.bf16 %v522_v61, %v521_v60 }
 0x1d9   : > { %600 = vmatmul.bf16.vlgmr.msra.gmra.mxu3 %v523_v62 }
 0x25c   : > { %v601_v0 = vpop.f32.mrf.mxu3 }
 0x25d   : > { %v602_v1 = vadd.f32 %v881_v63, %v601_v0 }
 0x25f   : > { %607 = vst.msk [vmem:[%s243_s11] sm:$0xff] %vm606_vm6, %v602_v1 }
 0x264   : > { %v603_v2 = vpop.f32.mrf.mxu3 }
 0x265   : > { %v604_v3 = vadd.f32 %v881_v63, %v603_v2 }
 0x267   : > { %608 = vst.msk [vmem:[%s243_s11 + $0x8] sm:$0xff] %vm606_vm6, %v604_v3 }
 0x268 PF: > { %s16_s18 = sadd.s32 1, %s922_s18  }
 0x269   : > { %p13_p7 = scmp.ge.s32.totalorder %s16_s18, 6  }
 0x26b   :  { %15 = sbr.rel (!%p13_p7) target bundleno = 1 (0x1), region = 79 }
 0x270   :  { %631 = vsyncpa [#allocation3], 1 }
 0x271   :  { %633 = vsyncpa [#allocation3 + $0x1], 1 }

</bundles_post_ra>
